<compile_context>
chip_gen: v6e
topology: v6e:2x2x1
jax: 0.10.0
libtpu: 0.0.40
codegen_flags: <defaults>
</compile_context>

<pallas_src>
import jax
import jax.numpy as jnp
from jax.experimental import pallas as pl
from jax.experimental.pallas import tpu as pltpu

H_PAD = 128   # lane-dense hidden width (real hidden = 32, zero padded)
IN_PAD = 128  # lane-dense input width  (real in_dim = 116, zero padded)


def _round_up(a, b):
    return (a + b - 1) // b * b


# ------------- kernel 1: input projection  xp = x @ W1^T (padded) -----------
def proj_kernel(x_ref, w1_ref, xp_ref):
    xp_ref[...] = jnp.dot(x_ref[...], w1_ref[...],
                          preferred_element_type=jnp.float32)


# ------------- kernel 2: (A+I) aggregation + fused MLP tail + BN + ReLU -----
def agg_mlp_kernel(adj_ref, xp_ref, w2_ref, vecs_ref, o_ref, acc_ref):
    k = pl.program_id(1)

    @pl.when(k == 0)
    def _init():
        acc_ref[...] = jnp.zeros_like(acc_ref)

    # agg[i_tile] += (A+I)[i_tile, k_tile] @ xp[k_tile]
    # adj is bf16 (exact integer counts); cast -> f32 keeps exact numerics
    # while halving adjacency HBM/VMEM traffic.
    acc_ref[...] += jnp.dot(adj_ref[...].astype(jnp.float32), xp_ref[...],
                            preferred_element_type=jnp.float32)

    @pl.when(k == pl.num_programs(1) - 1)
    def _epilogue():
        b1 = vecs_ref[0:1, :]
        b2 = vecs_ref[1:2, :]
        bn_scale = vecs_ref[2:3, :]
        bn_shift = vecs_ref[3:4, :]
        h = jnp.maximum(acc_ref[...] + b1, 0.0)                     # Linear1 bias + ReLU
        h = jnp.dot(h, w2_ref[...],
                    preferred_element_type=jnp.float32) + b2        # Linear2
        h = jnp.maximum(h, 0.0)                                     # ReLU
        h = h * bn_scale + bn_shift                                 # eval-mode BN (folded)
        o_ref[...] = jnp.maximum(h, 0.0)                            # outer F.relu


def gin_forward(x, edge_index, params, *, max_tile=512):
    """x: [N, 116] f32, edge_index: [2, E] int32 -> [N, hidden] f32."""
    n, in_dim = x.shape
    hidden = params["w1"].shape[0]

    # ----- tile / padding bookkeeping (lane-dense, (8,128)-friendly) --------
    t = min(max_tile, _round_up(n, 128))
    n_pad = _round_up(n, t)

    # ----- glue: dense (A + I), A[i,j] = #edges j->i, stored bf16 -----------
    src, dst = edge_index[0], edge_index[1]
    adj = jnp.zeros((n_pad, n_pad), jnp.float32).at[dst, src].add(1.0)
    ids = jnp.arange(n)
    adj = adj.at[ids, ids].add(1.0)          # self loop == the "x + agg" term
    adj = adj.astype(jnp.bfloat16)           # exact for small integer counts

    # ----- zero-pad features / params to 128-lane widths ---------------------
    x_pad = jnp.zeros((n_pad, IN_PAD), jnp.float32).at[:n, :in_dim].set(x)
    w1_pad = jnp.zeros((IN_PAD, H_PAD), jnp.float32).at[:in_dim, :hidden].set(
        params["w1"].T)
    w2_pad = jnp.zeros((H_PAD, H_PAD), jnp.float32).at[:hidden, :hidden].set(
        params["w2"].T)

    inv_std = 1.0 / jnp.sqrt(params["bn_running_var"] + 1e-5)
    scale = params["bn_gamma"] * inv_std
    shift = params["bn_beta"] - params["bn_running_mean"] * scale

    # Pack the 4 per-channel vectors into one (8, 128) sublane-aligned block:
    # row 0 = b1, row 1 = b2, row 2 = bn_scale, row 3 = bn_shift.
    vecs = jnp.zeros((8, H_PAD), jnp.float32)
    vecs = vecs.at[0, :hidden].set(params["b1"])
    vecs = vecs.at[1, :hidden].set(params["b2"])
    vecs = vecs.at[2, :hidden].set(scale)
    vecs = vecs.at[3, :hidden].set(shift)

    # ----- kernel 1: project first (reassociation), xp = x @ W1^T -----------
    xp = pl.pallas_call(
        proj_kernel,
        out_shape=jax.ShapeDtypeStruct((n_pad, H_PAD), jnp.float32),
        grid=(n_pad // t,),
        in_specs=[pl.BlockSpec((t, IN_PAD), lambda i: (i, 0)),
                  pl.BlockSpec((IN_PAD, H_PAD), lambda i: (0, 0))],
        out_specs=pl.BlockSpec((t, H_PAD), lambda i: (i, 0)),
        compiler_params=pltpu.CompilerParams(
            dimension_semantics=("parallel",),
            vmem_limit_bytes=32 << 20),
    )(x_pad, w1_pad)

    # ----- kernel 2: tiled aggregation matmul + fused MLP/BN/ReLU epilogue --
    out_pad = pl.pallas_call(
        agg_mlp_kernel,
        out_shape=jax.ShapeDtypeStruct((n_pad, H_PAD), jnp.float32),
        grid=(n_pad // t, n_pad // t),
        in_specs=[
            pl.BlockSpec((t, t), lambda i, k: (i, k)),          # (A+I), bf16
            pl.BlockSpec((t, H_PAD), lambda i, k: (k, 0)),      # projected x
            pl.BlockSpec((H_PAD, H_PAD), lambda i, k: (0, 0)),  # W2^T (padded)
            pl.BlockSpec((8, H_PAD), lambda i, k: (0, 0)),      # packed b1/b2/BN
        ],
        out_specs=pl.BlockSpec((t, H_PAD), lambda i, k: (i, 0)),
        scratch_shapes=[pltpu.VMEM((t, H_PAD), jnp.float32)],
        compiler_params=pltpu.CompilerParams(
            dimension_semantics=("parallel", "arbitrary"),
            vmem_limit_bytes=32 << 20),
    )(adj, xp, w2_pad, vecs)

    return out_pad[:n, :hidden]


def init_params(key, in_dim=116, hidden=32):
    k1, k2, k3, k4 = jax.random.split(key, 4)
    s1 = 1.0 / jnp.sqrt(jnp.float32(in_dim))
    s2 = 1.0 / jnp.sqrt(jnp.float32(hidden))
    return {
        "w1": jax.random.uniform(k1, (hidden, in_dim), jnp.float32, -s1, s1),
        "b1": jax.random.uniform(k2, (hidden,), jnp.float32, -s1, s1),
        "w2": jax.random.uniform(k3, (hidden, hidden), jnp.float32, -s2, s2),
        "b2": jax.random.uniform(k4, (hidden,), jnp.float32, -s2, s2),
        "bn_gamma": jnp.ones((hidden,), jnp.float32),
        "bn_beta": jnp.zeros((hidden,), jnp.float32),
        "bn_running_mean": jnp.zeros((hidden,), jnp.float32),
        "bn_running_var": jnp.ones((hidden,), jnp.float32),
    }


def gin_reference(x, edge_index, params):
    """Pure-JAX reference of the same forward pass."""
    src, dst = edge_index[0], edge_index[1]
    agg = jnp.zeros_like(x).at[dst].add(x[src])
    h = x + agg
    h = jnp.maximum(h @ params["w1"].T + params["b1"], 0.0)
    h = jnp.maximum(h @ params["w2"].T + params["b2"], 0.0)
    inv_std = 1.0 / jnp.sqrt(params["bn_running_var"] + 1e-5)
    h = (h - params["bn_running_mean"]) * inv_std * params["bn_gamma"] + params["bn_beta"]
    return jnp.maximum(h, 0.0)


if __name__ == "__main__":
    N, IN_DIM, HIDDEN, E = 64, 116, 32, 200

    key = jax.random.PRNGKey(0)
    kx, ke, kp = jax.random.split(key, 3)

    x = jax.random.normal(kx, (N, IN_DIM), jnp.float32)
    edge_index = jax.random.randint(ke, (2, E), 0, N, jnp.int32)
    params = init_params(kp, IN_DIM, HIDDEN)

    out = gin_forward(x, edge_index, params)
    out = jax.block_until_ready(out)

    ref = gin_reference(x, edge_index, params)
    assert out.shape == (N, HIDDEN)
    assert jnp.allclose(out, ref, atol=1e-4, rtol=1e-4), "mismatch vs reference"

    print("KERNEL_OK")
</pallas_src>

<mosaic_0001>
module attributes {stable_mosaic.version = 11 : i64} {
  func.func @proj_kernel(%arg0: i32, %arg1: memref<128x128xf32, #tpu.memory_space<vmem>>, %arg2: memref<128x128xf32, #tpu.memory_space<vmem>>, %arg3: memref<128x128xf32, #tpu.memory_space<vmem>>) attributes {dimension_semantics = [#tpu.dimension_semantics<parallel>], iteration_bounds = array<i64: 1>, scalar_prefetch = 0 : i64, scratch_operands = 0 : i64, tpu.core_type = #tpu.core_type<tc>, window_params = [{transform_indices = @transform_0, window_bounds = array<i64: 128, 128>}, {pipeline_mode = #tpu.pipeline_mode<synchronous>, transform_indices = @transform_1, window_bounds = array<i64: 128, 128>}, {transform_indices = @transform_2, window_bounds = array<i64: 128, 128>}]} {
    %c0 = arith.constant 0 : index
    %c0_0 = arith.constant 0 : index
    %0 = vector.load %arg1[%c0, %c0_0] : memref<128x128xf32, #tpu.memory_space<vmem>>, vector<128x128xf32>
    %c0_1 = arith.constant 0 : index
    %c0_2 = arith.constant 0 : index
    %1 = vector.load %arg2[%c0_1, %c0_2] : memref<128x128xf32, #tpu.memory_space<vmem>>, vector<128x128xf32>
    %cst = arith.constant dense<0.000000e+00> : vector<128x128xf32>
    %2 = tpu.matmul %0, %1, %cst {dimension_numbers = #tpu.dot_dimension_numbers<[1], [0], [0], [1], [0, 0, 1, 1], [], []>} : vector<128x128xf32>, vector<128x128xf32>, vector<128x128xf32> -> vector<128x128xf32>
    %c0_3 = arith.constant 0 : index
    %c0_4 = arith.constant 0 : index
    %3 = vector.load %arg3[%c0_3, %c0_4] : memref<128x128xf32, #tpu.memory_space<vmem>>, vector<128x128xf32>
    tpu.vector_store %arg3[%c0_3, %c0_4], %2 {strides = array<i32>} : memref<128x128xf32, #tpu.memory_space<vmem>>, vector<128x128xf32>,
    return
  }
  func.func @transform_0(%arg0: i32) -> (i32, i32) {
    %c0_i32 = arith.constant 0 : i32
    %c0_i32_0 = arith.constant 0 : i32
    return %arg0, %c0_i32 : i32, i32
  }
  func.func @transform_1(%arg0: i32) -> (i32, i32) {
    %c0_i32 = arith.constant 0 : i32
    %c0_i32_0 = arith.constant 0 : i32
    %c0_i32_1 = arith.constant 0 : i32
    return %c0_i32, %c0_i32_0 : i32, i32
  }
  func.func @transform_2(%arg0: i32) -> (i32, i32) {
    %c0_i32 = arith.constant 0 : i32
    %c0_i32_0 = arith.constant 0 : i32
    return %arg0, %c0_i32 : i32, i32
  }
}

</mosaic_0001>

<bundles_post_ra>
// kernel: tpu_custom_call.1
= control target key start
LH: loop header
LB: loop body
LE: loop exit
PB: predicated region body
PF: predicated region fallthrough
CT: control target
= control target key end

     0   :  { %7 = vsyncpa [#allocation3], 0  ;;  %s480_s0 = inlined_call_operand.hbm [shape: f32[128,128], index: 0, kind: input, shape index: {}]   ;;  %s481_s1 = inlined_call_operand.hbm [shape: f32[128,128], index: 1, kind: input, shape index: {}]   ;;  %s482_s2 = inlined_call_operand.hbm [shape: f32[128,128], index: 2, kind: output, shape index: {}]  }
   0x1   :  { %8 = vsyncpa [#allocation6], 0 }
   0x2   :  { %9 = vsyncpa [#allocation4], 0  ;;  %s442_s9 = smov [#allocation2]  }
   0x3   :  { %s15_s10 = sshll.u32 %s442_s9, 4  ;;  %s16_s10 = int_to_ptr.vmem [resolvable:$true] %s15_s10 }
   0x4   :  { %s384_s11 = scalar_lea.vmem %s16_s10, 2048  ;;  %p389_p1 = scmp.lt.s32.totalorder %s16_s10, %s16_s10 }
   0x5   :  { %p385_p0 = scmp.ne.s32.totalorder %s16_s10, %s384_s11  ;;  %p390_p2 = scmp.lt.s32.totalorder %s384_s11, %s384_s11 }
   0x7   :  { %p391_p3 = por %p390_p2, %p389_p1 }
   0x9   :  { %p392_p4 = pnand %p391_p3, %p385_p0 }
   0xb   :  { %395 = shalt.err (!%p392_p4)
}
   0xc   :  { %s443_s12 = smov 128   ;;  %s444_s13 = smov 8  }
   0xd   :  { %21 = dma.hbm_to_vmem [thread:$0]  %s480_s0, 2048, %s16_s10, [#allocation3], %s443_s12, %s443_s12, %s444_s13  }
   0xe   :  { %s445_s16 = smov [#allocation5]  }
   0xf   :  { %s27_s17 = sshll.u32 %s445_s16, 4  ;;  %s28_s17 = int_to_ptr.vmem [resolvable:$true] %s27_s17 }
  0x10   :  { %s404_s18 = scalar_lea.vmem %s28_s17, 2048  ;;  %p409_p6 = scmp.lt.s32.totalorder %s28_s17, %s28_s17 }
  0x11   :  { %p405_p5 = scmp.ne.s32.totalorder %s28_s17, %s404_s18  ;;  %p410_p7 = scmp.lt.s32.totalorder %s404_s18, %s404_s18 }
  0x13   :  { %p411_p8 = por %p410_p7, %p409_p6 }
  0x15   :  { %p412_p9 = pnand %p411_p8, %p405_p5 }
  0x17   :  { %415 = shalt.err (!%p412_p9)
}
  0x18   :  { %33 = dma.hbm_to_vmem [thread:$0]  %s481_s1, 2048, %s28_s17, [#allocation6], %s443_s12, %s443_s12, %s444_s13  }
  0x19   :  { %436 = dma.done.wait [#allocation3], 2048  }
  0x1a   :  { %437 = vsyncadd [#allocation3], 4294965248 }
  0x1b   :  { %438 = dma.done.wait [#allocation6], 2048  }
  0x1c   :  { %439 = vsyncadd [#allocation6], 4294965248  ;;  %v71_v0 = vld [vmem:[#allocation5 + $0x78] sm:$0xff]  ;;  %v70_v1 = vld [vmem:[#allocation5 + $0x70] sm:$0xff]  ;;  %s446_s0 = smov [#allocation7]  }
  0x1d   :  { %283 = vmatprep.subr.mxu0 %v71_v0  ;;  %339 = vmatprep.subr.mxu1 %v71_v0  ;;  %v69_v2 = vld [vmem:[#allocation5 + $0x68] sm:$0xff]  ;;  %v68_v3 = vld [vmem:[#allocation5 + $0x60] sm:$0xff]  ;;  %v67_v4 = vld [vmem:[#allocation5 + $0x58] sm:$0xff]  ;;  %s238_s1 = sshll.u32 %s446_s0, 4  ;;  %s239_s1 = int_to_ptr.vmem [resolvable:$true] %s238_s1 }
  0x1e   :  { %284 = vmatpush3.msra.mxu0 %v71_v0  ;;  %355 = vmatpush3.msra.mxu1 %v71_v0  ;;  %v66_v5 = vld [vmem:[#allocation5 + $0x50] sm:$0xff]  ;;  %v65_v6 = vld [vmem:[#allocation5 + $0x48] sm:$0xff]  ;;  %v64_v7 = vld [vmem:[#allocation5 + $0x40] sm:$0xff]  ;;  %s416_s21 = scalar_lea.vmem %s239_s1, 2048  ;;  %p421_p11 = scmp.lt.s32.totalorder %s239_s1, %s239_s1 }
  0x1f   :  { %285 = vmatprep.subr.mxu0 %v70_v1  ;;  %340 = vmatprep.subr.mxu1 %v70_v1  ;;  %v63_v8 = vld [vmem:[#allocation5 + $0x38] sm:$0xff]  ;;  %v62_v9 = vld [vmem:[#allocation5 + $0x30] sm:$0xff]  ;;  %v61_v10 = vld [vmem:[#allocation5 + $0x28] sm:$0xff]  ;;  %p417_p10 = scmp.ne.s32.totalorder %s239_s1, %s416_s21  ;;  %p422_p12 = scmp.lt.s32.totalorder %s416_s21, %s416_s21 }
  0x20   :  { %286 = vmatpush3.msra.mxu0 %v70_v1  ;;  %356 = vmatpush3.msra.mxu1 %v70_v1  ;;  %v60_v11 = vld [vmem:[#allocation5 + $0x20] sm:$0xff]  ;;  %v59_v12 = vld [vmem:[#allocation5 + $0x18] sm:$0xff]  ;;  %v58_v13 = vld [vmem:[#allocation5 + $0x10] sm:$0xff] }
  0x21   :  { %287 = vmatprep.subr.mxu0 %v69_v2  ;;  %341 = vmatprep.subr.mxu1 %v69_v2  ;;  %v57_v14 = vld [vmem:[#allocation5 + $0x8] sm:$0xff]  ;;  %v56_v15 = vld [vmem:[#allocation5] sm:$0xff]  ;;  %v42_v20 = vld [vmem:[#allocation2 + $0x10] sm:$0xff]  ;;  %p423_p13 = por %p422_p12, %p421_p11 }
  0x22   :  { %288 = vmatpush3.msra.mxu0 %v69_v2  ;;  %357 = vmatpush3.msra.mxu1 %v69_v2  ;;  %v40_v16 = vld [vmem:[#allocation2] sm:$0xff]  ;;  %v41_v18 = vld [vmem:[#allocation2 + $0x8] sm:$0xff]  ;;  %v50_v21 = vld [vmem:[#allocation2 + $0x50] sm:$0xff] }
  0x23   :  { %289 = vmatprep.subr.mxu0 %v68_v3  ;;  %342 = vmatprep.subr.mxu1 %v68_v3  ;;  %v48_v17 = vld [vmem:[#allocation2 + $0x40] sm:$0xff]  ;;  %v49_v19 = vld [vmem:[#allocation2 + $0x48] sm:$0xff]  ;;  %v43_v22 = vld [vmem:[#allocation2 + $0x18] sm:$0xff]  ;;  %p424_p0 = pnand %p423_p13, %p417_p10 }
  0x24   :  { %290 = vmatpush3.msra.mxu0 %v68_v3  ;;  %358 = vmatpush3.msra.mxu1 %v68_v3  ;;  %v51_v23 = vld [vmem:[#allocation2 + $0x58] sm:$0xff]  ;;  %v44_v24 = vld [vmem:[#allocation2 + $0x20] sm:$0xff]  ;;  %v45_v26 = vld [vmem:[#allocation2 + $0x28] sm:$0xff] }
  0x25   :  { %291 = vmatprep.subr.mxu0 %v67_v4  ;;  %343 = vmatprep.subr.mxu1 %v67_v4  ;;  %v52_v25 = vld [vmem:[#allocation2 + $0x60] sm:$0xff]  ;;  %v53_v27 = vld [vmem:[#allocation2 + $0x68] sm:$0xff]  ;;  %v46_v28 = vld [vmem:[#allocation2 + $0x30] sm:$0xff] }
  0x26   :  { %292 = vmatpush3.msra.mxu0 %v67_v4  ;;  %359 = vmatpush3.msra.mxu1 %v67_v4  ;;  %v54_v29 = vld [vmem:[#allocation2 + $0x70] sm:$0xff]  ;;  %v47_v30 = vld [vmem:[#allocation2 + $0x38] sm:$0xff] }
  0x27   :  { %293 = vmatprep.subr.mxu0 %v66_v5  ;;  %344 = vmatprep.subr.mxu1 %v66_v5  ;;  %v55_v31 = vld [vmem:[#allocation2 + $0x78] sm:$0xff] }
  0x28   :  { %294 = vmatpush3.msra.mxu0 %v66_v5  ;;  %360 = vmatpush3.msra.mxu1 %v66_v5 }
  0x29   :  { %295 = vmatprep.subr.mxu0 %v65_v6  ;;  %345 = vmatprep.subr.mxu1 %v65_v6 }
  0x2a   :  { %296 = vmatpush3.msra.mxu0 %v65_v6  ;;  %361 = vmatpush3.msra.mxu1 %v65_v6 }
  0x2b   :  { %297 = vmatprep.subr.mxu0 %v64_v7  ;;  %346 = vmatprep.subr.mxu1 %v64_v7 }
  0x2c   :  { %298 = vmatpush3.msra.mxu0 %v64_v7  ;;  %362 = vmatpush3.msra.mxu1 %v64_v7 }
  0x2d   :  { %299 = vmatprep.subr.mxu0 %v63_v8  ;;  %347 = vmatprep.subr.mxu1 %v63_v8 }
  0x2e   :  { %300 = vmatpush3.msra.mxu0 %v63_v8  ;;  %363 = vmatpush3.msra.mxu1 %v63_v8 }
  0x2f   :  { %301 = vmatprep.subr.mxu0 %v62_v9  ;;  %348 = vmatprep.subr.mxu1 %v62_v9 }
  0x30   :  { %302 = vmatpush3.msra.mxu0 %v62_v9  ;;  %364 = vmatpush3.msra.mxu1 %v62_v9 }
  0x31   :  { %303 = vmatprep.subr.mxu0 %v61_v10  ;;  %349 = vmatprep.subr.mxu1 %v61_v10 }
  0x32   :  { %304 = vmatpush3.msra.mxu0 %v61_v10  ;;  %365 = vmatpush3.msra.mxu1 %v61_v10 }
  0x33   :  { %305 = vmatprep.subr.mxu0 %v60_v11  ;;  %350 = vmatprep.subr.mxu1 %v60_v11 }
  0x34   :  { %306 = vmatpush3.msra.mxu0 %v60_v11  ;;  %366 = vmatpush3.msra.mxu1 %v60_v11 }
  0x35   :  { %307 = vmatprep.subr.mxu0 %v59_v12  ;;  %351 = vmatprep.subr.mxu1 %v59_v12 }
  0x36   :  { %308 = vmatpush3.msra.mxu0 %v59_v12  ;;  %367 = vmatpush3.msra.mxu1 %v59_v12 }
  0x37   :  { %309 = vmatprep.subr.mxu0 %v58_v13  ;;  %352 = vmatprep.subr.mxu1 %v58_v13 }
  0x38   :  { %310 = vmatpush3.msra.mxu0 %v58_v13  ;;  %368 = vmatpush3.msra.mxu1 %v58_v13 }
  0x39   :  { %311 = vmatprep.subr.mxu0 %v57_v14  ;;  %353 = vmatprep.subr.mxu1 %v57_v14 }
  0x3a   :  { %312 = vmatpush3.msra.mxu0 %v57_v14  ;;  %369 = vmatpush3.msra.mxu1 %v57_v14 }
  0x3b   :  { %313 = vmatprep.subr.mxu0 %v56_v15  ;;  %354 = vmatprep.subr.mxu1 %v56_v15 }
  0x3c   :  { %314 = vmatpush3.msra.mxu0 %v56_v15  ;;  %370 = vmatpush3.msra.mxu1 %v56_v15 }
  0x3d   :  { %315 = vmatprep.mubr.f32.mxu0 %v40_v16  ;;  %327 = vmatprep.mubr.f32.mxu1 %v48_v17 }
  0x3e   :  { %316 = vmatmul.mubr.f32.vlgmr.msra.gmra.mxu0 %v41_v18  ;;  %328 = vmatmul.mubr.f32.vlgmr.msra.gmra.mxu1 %v49_v19 }
  0x3f   :  { %318 = vmatprep.mubr.f32.mxu0 %v42_v20  ;;  %330 = vmatprep.mubr.f32.mxu1 %v50_v21 }
  0x42   :  { %319 = vmatmul.mubr.f32.gmra.mxu0 %v43_v22  ;;  %331 = vmatmul.mubr.f32.gmra.mxu1 %v51_v23 }
  0x43   :  { %321 = vmatprep.mubr.f32.mxu0 %v44_v24  ;;  %333 = vmatprep.mubr.f32.mxu1 %v52_v25 }
  0x46   :  { %322 = vmatmul.mubr.f32.gmra.mxu0 %v45_v26  ;;  %334 = vmatmul.mubr.f32.gmra.mxu1 %v53_v27 }
  0x47   :  { %324 = vmatprep.mubr.f32.mxu0 %v46_v28  ;;  %336 = vmatprep.mubr.f32.mxu1 %v54_v29 }
  0x4a   :  { %325 = vmatmul.mubr.f32.gmra.mxu0 %v47_v30  ;;  %337 = vmatmul.mubr.f32.gmra.mxu1 %v55_v31 }
  0xfe   :  { %v317_v32 = vpop.f32.mrf.mxu0  ;;  %v329_v33 = vpop.f32.mrf.mxu1 }
  0xff   :  { %218 = vst [vmem:[#allocation7 + $0x8] sm:$0xff] %v317_v32  ;;  %226 = vst [vmem:[#allocation7 + $0x48] sm:$0xff] %v329_v33 }
 0x100   :  { %v138_v34 = vpop.f32.mrf.mxu0  ;;  %v178_v35 = vpop.f32.mrf.mxu1 }
 0x101   :  { %217 = vst [vmem:[#allocation7] sm:$0xff] %v138_v34  ;;  %225 = vst [vmem:[#allocation7 + $0x40] sm:$0xff] %v178_v35 }
 0x102   :  { %v320_v36 = vpop.f32.mrf.mxu0  ;;  %v332_v37 = vpop.f32.mrf.mxu1 }
 0x103   :  { %220 = vst [vmem:[#allocation7 + $0x18] sm:$0xff] %v320_v36  ;;  %228 = vst [vmem:[#allocation7 + $0x58] sm:$0xff] %v332_v37 }
 0x104   :  { %v148_v38 = vpop.f32.mrf.mxu0  ;;  %v188_v39 = vpop.f32.mrf.mxu1 }
 0x105   :  { %219 = vst [vmem:[#allocation7 + $0x10] sm:$0xff] %v148_v38  ;;  %227 = vst [vmem:[#allocation7 + $0x50] sm:$0xff] %v188_v39 }
 0x106   :  { %v323_v40 = vpop.f32.mrf.mxu0  ;;  %v335_v41 = vpop.f32.mrf.mxu1 }
 0x107   :  { %222 = vst [vmem:[#allocation7 + $0x28] sm:$0xff] %v323_v40  ;;  %230 = vst [vmem:[#allocation7 + $0x68] sm:$0xff] %v335_v41 }
 0x108   :  { %v158_v42 = vpop.f32.mrf.mxu0  ;;  %v198_v43 = vpop.f32.mrf.mxu1 }
 0x109   :  { %221 = vst [vmem:[#allocation7 + $0x20] sm:$0xff] %v158_v42  ;;  %229 = vst [vmem:[#allocation7 + $0x60] sm:$0xff] %v198_v43 }
 0x10a   :  { %v326_v44 = vpop.f32.mrf.mxu0  ;;  %v338_v45 = vpop.f32.mrf.mxu1 }
 0x10b   :  { %224 = vst [vmem:[#allocation7 + $0x38] sm:$0xff] %v326_v44  ;;  %232 = vst [vmem:[#allocation7 + $0x78] sm:$0xff] %v338_v45 }
 0x10c   :  { %v168_v46 = vpop.f32.mrf.mxu0  ;;  %v208_v47 = vpop.f32.mrf.mxu1 }
 0x10d   :  { %223 = vst [vmem:[#allocation7 + $0x30] sm:$0xff] %v168_v46  ;;  %231 = vst [vmem:[#allocation7 + $0x70] sm:$0xff] %v208_v47 }
 0x10e   :  { %427 = shalt.err (!%p424_p0)
}
 0x10f   :  { %244 = dma.vmem_to_hbm [thread:$0]  %s239_s1, 2048, %s482_s2, [#allocation4], %s443_s12, %s443_s12, %s444_s13  }
 0x110   :  { %440 = dma.done.wait [#allocation4], 2048  }
 0x111   :  { %441 = vsyncadd [#allocation4], 4294965248 }
 0x112   :  { %248 = vsyncpa [#allocation3], 1 }
 0x113   :  { %249 = vsyncpa [#allocation6], 1 }
 0x114   :  { %250 = vsyncpa [#allocation4], 1 }

</bundles_post_ra>
